<compile_context>
chip_gen: v6e
topology: v6e:2x2x1
jax: 0.10.0
libtpu: 0.0.40
codegen_flags: <defaults>
</compile_context>

<pallas_src>
import functools

import jax
import jax.numpy as jnp
from jax.experimental import pallas as pl
from jax.experimental.pallas import tpu as pltpu


def _round_up(x, m):
    return (x + m - 1) // m * m


def _vmem_limit(block_bytes):
    # blocks + headroom, clamped to a cross-generation safe range (v7x has 64 MiB/TC)
    return int(min(max(block_bytes + (16 << 20), 32 << 20), 48 << 20))


# ----------------------------- Pallas kernel --------------------------------

def _conv_mm_kernel(*refs, add_bias: bool, with_stats: bool, nk: int,
                    slice_w: bool, tk_eff: int):
    """One (M-tile, K-tile) step of  y = W @ patches  with lane-dense output.

    Inputs : patches (tk_eff, TM), W (Cout_pad, K_pad or tk_eff), [bias (Cout_pad, 1)]
    Outputs: y (Cout_pad, TM) f32 (resident across the K grid axis, accumulated in place),
             [psum / psqr (1, Cout_pad, 1) per-M-tile BN partials, written at the last k]
    """
    if add_bias:
        p_ref, w_ref, b_ref = refs[:3]
        rest = refs[3:]
    else:
        p_ref, w_ref = refs[:2]
        b_ref = None
        rest = refs[2:]
    if with_stats:
        y_ref, psum_ref, psqr_ref = rest
    else:
        (y_ref,) = rest

    k = pl.program_id(1)

    if slice_w:
        off = pl.multiple_of(k * tk_eff, 128)
        w = w_ref[:, pl.ds(off, tk_eff)]
    else:
        w = w_ref[...]

    contrib = jnp.dot(w, p_ref[...], preferred_element_type=jnp.float32)

    if nk == 1:
        y = contrib
        if add_bias:
            y = y + b_ref[...]
        y_ref[...] = y
        if with_stats:
            psum_ref[0] = jnp.sum(y, axis=1, keepdims=True)
            psqr_ref[0] = jnp.sum(y * y, axis=1, keepdims=True)
        return

    @pl.when(k == 0)
    def _first():
        y_ref[...] = contrib

    @pl.when(k != 0)
    def _accumulate():
        y_ref[...] += contrib

    @pl.when(k == nk - 1)
    def _finalize():
        y = y_ref[...]
        if add_bias:
            y = y + b_ref[...]
            y_ref[...] = y
        if with_stats:
            # Cheap XLU/VPU filler under the MXU; blocks are disjoint per M-tile,
            # so the M grid axis stays "parallel" (megacore-safe).
            psum_ref[0] = jnp.sum(y, axis=1, keepdims=True)
            psqr_ref[0] = jnp.sum(y * y, axis=1, keepdims=True)


# ------------------------------ Host wrapper ---------------------------------

@functools.partial(jax.jit,
                   static_argnames=("activation", "batch_norm", "tm", "tk", "mxu_dtype"))
def conv_block(x, w, b, gamma, beta, *, activation=True, batch_norm=True,
               tm=512, tk=512, mxu_dtype=jnp.bfloat16):
    """ConvBlock forward. x: NCHW float32; w: (Cout, Cin, 4, 4); returns NCHW float32."""
    N, Cin, H, W_ = x.shape
    Cout, _, KH, KW = w.shape
    stride, pad = 2, 1
    OH = (H + 2 * pad - KH) // stride + 1
    OW = (W_ + 2 * pad - KW) // stride + 1
    M = N * OH * OW
    K = Cin * KH * KW

    # ---- tile sizes / padded extents (lane-dense: M on lanes, Cout on sublanes)
    tm = max(128, min(_round_up(tm, 128), _round_up(M, 128)))   # don't over-pad tiny M
    M_pad = _round_up(M, tm)
    nmt = M_pad // tm
    Cout_pad = _round_up(Cout, 16)
    tk = max(128, (tk // 128) * 128)
    if K <= tk:
        tk_eff, K_pad, nk = K, K, 1
    else:
        tk_eff, K_pad = tk, _round_up(K, tk)
        nk = K_pad // tk_eff

    item = jnp.dtype(mxu_dtype).itemsize
    add_bias = not batch_norm
    with_stats = batch_norm

    # ---- glue: LeakyReLU + zero-pad + im2col produced directly in [K, M] layout.
    # lrelu commutes with the zero padding (lrelu(0)=0); applied on f32 x and cast to the
    # MXU dtype BEFORE the gather so the 4x-amplified patch stream is half-width.
    a = jnp.where(x >= 0, x, 0.2 * x) if activation else x
    a = a.astype(mxu_dtype)
    xp = jnp.pad(a, ((0, 0), (0, 0), (pad, pad), (pad, pad)))
    cols = [xp[:, :, ki:ki + stride * OH:stride, kj:kj + stride * OW:stride]
            for ki in range(KH) for kj in range(KW)]
    patches = jnp.stack(cols, axis=2)            # [N, Cin, KH*KW, OH, OW]
    patches = patches.transpose(1, 2, 0, 3, 4)   # [Cin, KH*KW, N, OH, OW]
    patches = patches.reshape(K, M)
    patches = jnp.pad(patches, ((0, K_pad - K), (0, M_pad - M)))
    # TODO(synk): fuse im2col into the kernel via memory_space=pl.ANY + strided make_async_copy.

    w_mat = w.reshape(Cout, K).astype(mxu_dtype)                 # (cin, kh, kw) column order
    w_mat = jnp.pad(w_mat, ((0, Cout_pad - Cout), (0, K_pad - K)))

    # ---- decide whether the whole weight matrix stays resident in VMEM
    w_full_bytes = Cout_pad * K_pad * item
    base_bytes = 2 * tk_eff * tm * item + 2 * Cout_pad * tm * 4 + (2 << 20)
    w_resident = (nk == 1) or (base_bytes + 2 * w_full_bytes <= (36 << 20))
    slice_w = w_resident and nk > 1

    in_arrays = [patches, w_mat]
    in_specs = [pl.BlockSpec((tk_eff, tm), lambda i, k: (k, i))]
    if w_resident:
        in_specs.append(pl.BlockSpec((Cout_pad, K_pad), lambda i, k: (0, 0)))
        w_blk_bytes = w_full_bytes
    else:
        in_specs.append(pl.BlockSpec((Cout_pad, tk_eff), lambda i, k: (0, k)))
        w_blk_bytes = Cout_pad * tk_eff * item
    if add_bias:
        b_col = jnp.pad(b.astype(jnp.float32).reshape(Cout, 1),
                        ((0, Cout_pad - Cout), (0, 0)))
        in_arrays.append(b_col)
        in_specs.append(pl.BlockSpec((Cout_pad, 1), lambda i, k: (0, 0)))

    out_shape = [jax.ShapeDtypeStruct((Cout_pad, M_pad), jnp.float32)]
    out_specs = [pl.BlockSpec((Cout_pad, tm), lambda i, k: (0, i))]
    if with_stats:
        out_shape += [jax.ShapeDtypeStruct((nmt, Cout_pad, 1), jnp.float32)] * 2
        out_specs += [pl.BlockSpec((1, Cout_pad, 1), lambda i, k: (i, 0, 0))] * 2

    vmem_needed = 2 * tk_eff * tm * item + 2 * w_blk_bytes + 2 * Cout_pad * tm * 4 + (2 << 20)

    conv_outs = pl.pallas_call(
        functools.partial(_conv_mm_kernel, add_bias=add_bias, with_stats=with_stats,
                          nk=nk, slice_w=slice_w, tk_eff=tk_eff),
        out_shape=tuple(out_shape),
        grid_spec=pltpu.PrefetchScalarGridSpec(
            num_scalar_prefetch=0,
            grid=(nmt, nk),
            in_specs=in_specs,
            out_specs=tuple(out_specs),
        ),
        compiler_params=pltpu.CompilerParams(
            dimension_semantics=("parallel", "arbitrary"),
            vmem_limit_bytes=_vmem_limit(vmem_needed),
        ),
    )(*in_arrays)

    if not batch_norm:
        y_pad = conv_outs[0]
        return y_pad[:Cout, :M].reshape(Cout, N, OH, OW).transpose(1, 0, 2, 3)

    y_pad, psum, psqr = conv_outs

    # Tiny host-side reduction over M-tile partials (padded columns contribute exact zeros,
    # so dividing by the true M is exact).
    sum_c = jnp.sum(psum, axis=0)[:, 0]                       # (Cout_pad,)
    sq_c = jnp.sum(psqr, axis=0)[:, 0]
    mean = sum_c / M
    # NOTE: E[y^2]-E[y]^2 in f32; the clamp guards tiny negative values from cancellation.
    var = jnp.maximum(sq_c / M - mean * mean, 0.0)            # biased var (BN training mode)
    gamma_p = jnp.pad(gamma.astype(jnp.float32), (0, Cout_pad - Cout))
    beta_p = jnp.pad(beta.astype(jnp.float32), (0, Cout_pad - Cout))
    scale = gamma_p * jax.lax.rsqrt(var + 1e-5)
    # Conv bias intentionally omitted pre-BN: training-mode BN's batch-mean subtraction
    # cancels a per-channel constant exactly (do NOT reuse this path for eval-mode BN).
    shift = beta_p - mean * scale

    # BN apply folded into the un-pad / reshape / NCHW-transpose epilogue: a single fused
    # XLA pass over y (no standalone BN kernel, no extra HBM round-trip).
    y = y_pad[:Cout, :M] * scale[:Cout, None] + shift[:Cout, None]
    return y.reshape(Cout, N, OH, OW).transpose(1, 0, 2, 3)


# ------------------------------ Reference (pure JAX) -------------------------

def conv_block_ref(x, w, b, gamma, beta, *, activation=True, batch_norm=True):
    a = jnp.where(x >= 0, x, 0.2 * x) if activation else x
    y = jax.lax.conv_general_dilated(
        a, w, window_strides=(2, 2), padding=((1, 1), (1, 1)),
        dimension_numbers=("NCHW", "OIHW", "NCHW"),
    ) + b[None, :, None, None]
    if not batch_norm:
        return y
    mean = y.mean(axis=(0, 2, 3), keepdims=True)
    var = ((y - mean) ** 2).mean(axis=(0, 2, 3), keepdims=True)
    return (y - mean) * jax.lax.rsqrt(var + 1e-5) * gamma[None, :, None, None] \
        + beta[None, :, None, None]


# ---------------------------------- main -------------------------------------

if __name__ == "__main__":
    key = jax.random.PRNGKey(0)
    k_x, k_w, k_b, k_x2, k_w2 = jax.random.split(key, 5)

    N, in_ch, H, W = 2, 4, 16, 16
    out_ch = 8

    x = jax.random.normal(k_x, (N, in_ch, H, W), dtype=jnp.float32)
    w = 0.05 * jax.random.normal(k_w, (out_ch, in_ch, 4, 4), dtype=jnp.float32)
    b = 0.1 * jax.random.normal(k_b, (out_ch,), dtype=jnp.float32)
    gamma = jnp.ones((out_ch,), dtype=jnp.float32)   # BatchNorm2d default init
    beta = jnp.zeros((out_ch,), dtype=jnp.float32)

    ref = conv_block_ref(x, w, b, gamma, beta, activation=True, batch_norm=True)

    # 1) Structural correctness at tight tolerance (f32 MXU operands, nk == 1 path).
    out_f32 = jax.block_until_ready(
        conv_block(x, w, b, gamma, beta, activation=True, batch_norm=True,
                   mxu_dtype=jnp.float32))
    assert out_f32.shape == (N, out_ch, H // 2, W // 2)
    assert jnp.allclose(out_f32, ref, atol=1e-4, rtol=1e-4), "f32 BN path mismatch"

    out_nb = jax.block_until_ready(
        conv_block(x, w, b, gamma, beta, activation=False, batch_norm=False,
                   mxu_dtype=jnp.float32))
    ref_nb = conv_block_ref(x, w, b, gamma, beta, activation=False, batch_norm=False)
    assert jnp.allclose(out_nb, ref_nb, atol=1e-4, rtol=1e-4), "f32 no-BN path mismatch"

    # 2) K-tiled path (nk > 1): exercises in-place y_ref accumulation + resident-W slicing.
    in_ch2 = 16
    x2 = jax.random.normal(k_x2, (N, in_ch2, H, W), dtype=jnp.float32)
    w2 = 0.05 * jax.random.normal(k_w2, (out_ch, in_ch2, 4, 4), dtype=jnp.float32)
    ref2 = conv_block_ref(x2, w2, b, gamma, beta, activation=True, batch_norm=True)
    out2 = jax.block_until_ready(
        conv_block(x2, w2, b, gamma, beta, activation=True, batch_norm=True,
                   tk=128, mxu_dtype=jnp.float32))
    assert jnp.allclose(out2, ref2, atol=1e-4, rtol=1e-4), "f32 K-tiled BN path mismatch"

    # 3) Default fast path: bf16 MXU operands with f32 accumulation (relaxed tolerance).
    out = jax.block_until_ready(
        conv_block(x, w, b, gamma, beta, activation=True, batch_norm=True))
    assert out.shape == (N, out_ch, H // 2, W // 2)
    assert jnp.allclose(out, ref, atol=5e-2, rtol=5e-2), "bf16 BN path mismatch"

    print("KERNEL_OK")
</pallas_src>

<mosaic_0001>
module attributes {stable_mosaic.version = 11 : i64} {
  func.func @_conv_mm_kernel(%arg0: i32, %arg1: i32, %arg2: memref<64x128xf32, #tpu.memory_space<vmem>>, %arg3: memref<16x64xf32, #tpu.memory_space<vmem>>, %arg4: memref<16x128xf32, #tpu.memory_space<vmem>>, %arg5: memref<1x16x1xf32, #tpu.memory_space<vmem>>, %arg6: memref<1x16x1xf32, #tpu.memory_space<vmem>>) attributes {dimension_semantics = [#tpu.dimension_semantics<parallel>, #tpu.dimension_semantics<arbitrary>], iteration_bounds = array<i64: 1, 1>, scalar_prefetch = 0 : i64, scratch_operands = 0 : i64, tpu.core_type = #tpu.core_type<tc>, window_params = [{transform_indices = @transform_0, window_bounds = array<i64: 64, 128>}, {pipeline_mode = #tpu.pipeline_mode<synchronous>, transform_indices = @transform_1, window_bounds = array<i64: 16, 64>}, {transform_indices = @transform_2, window_bounds = array<i64: 16, 128>}, {transform_indices = @transform_3, window_bounds = array<i64: 1, 16, 1>}, {transform_indices = @transform_4, window_bounds = array<i64: 1, 16, 1>}]} {
    %c0 = arith.constant 0 : index
    %c0_0 = arith.constant 0 : index
    %0 = vector.load %arg3[%c0, %c0_0] : memref<16x64xf32, #tpu.memory_space<vmem>>, vector<16x64xf32>
    %c0_1 = arith.constant 0 : index
    %c0_2 = arith.constant 0 : index
    %1 = vector.load %arg2[%c0_1, %c0_2] : memref<64x128xf32, #tpu.memory_space<vmem>>, vector<64x128xf32>
    %cst = arith.constant dense<0.000000e+00> : vector<16x128xf32>
    %2 = tpu.matmul %0, %1, %cst {dimension_numbers = #tpu.dot_dimension_numbers<[1], [0], [0], [1], [0, 0, 1, 1], [], []>} : vector<16x64xf32>, vector<64x128xf32>, vector<16x128xf32> -> vector<16x128xf32>
    %c0_3 = arith.constant 0 : index
    %c0_4 = arith.constant 0 : index
    %3 = vector.load %arg4[%c0_3, %c0_4] : memref<16x128xf32, #tpu.memory_space<vmem>>, vector<16x128xf32>
    tpu.vector_store %arg4[%c0_3, %c0_4], %2 {strides = array<i32>} : memref<16x128xf32, #tpu.memory_space<vmem>>, vector<16x128xf32>,
    %cst_5 = arith.constant dense<0.000000e+00> : vector<16xf32>
    %4 = vector.multi_reduction <add>, %2, %cst_5 [1] : vector<16x128xf32> to vector<16xf32>
    %5 = vector.shape_cast %4 : vector<16xf32> to vector<16x1xf32>
    %c0_6 = arith.constant 0 : index
    %c0_7 = arith.constant 0 : index
    %c0_8 = arith.constant 0 : index
    %6 = vector.load %arg5[%c0_6, %c0_7, %c0_8] : memref<1x16x1xf32, #tpu.memory_space<vmem>>, vector<1x16x1xf32>
    %7 = vector.shape_cast %6 : vector<1x16x1xf32> to vector<16x1xf32>
    %8 = vector.shape_cast %5 : vector<16x1xf32> to vector<1x16x1xf32>
    tpu.vector_store %arg5[%c0_6, %c0_7, %c0_8], %8 {strides = array<i32>} : memref<1x16x1xf32, #tpu.memory_space<vmem>>, vector<1x16x1xf32>,
    %9 = arith.mulf %2, %2 : vector<16x128xf32>
    %cst_9 = arith.constant dense<0.000000e+00> : vector<16xf32>
    %10 = vector.multi_reduction <add>, %9, %cst_9 [1] : vector<16x128xf32> to vector<16xf32>
    %11 = vector.shape_cast %10 : vector<16xf32> to vector<16x1xf32>
    %c0_10 = arith.constant 0 : index
    %c0_11 = arith.constant 0 : index
    %c0_12 = arith.constant 0 : index
    %12 = vector.load %arg6[%c0_10, %c0_11, %c0_12] : memref<1x16x1xf32, #tpu.memory_space<vmem>>, vector<1x16x1xf32>
    %13 = vector.shape_cast %12 : vector<1x16x1xf32> to vector<16x1xf32>
    %14 = vector.shape_cast %11 : vector<16x1xf32> to vector<1x16x1xf32>
    tpu.vector_store %arg6[%c0_10, %c0_11, %c0_12], %14 {strides = array<i32>} : memref<1x16x1xf32, #tpu.memory_space<vmem>>, vector<1x16x1xf32>,
    return
  }
  func.func @transform_0(%arg0: i32, %arg1: i32) -> (i32, i32) {
    %c0_i32 = arith.constant 0 : i32
    return %arg1, %arg0 : i32, i32
  }
  func.func @transform_1(%arg0: i32, %arg1: i32) -> (i32, i32) {
    %c0_i32 = arith.constant 0 : i32
    %c0_i32_0 = arith.constant 0 : i32
    %c0_i32_1 = arith.constant 0 : i32
    return %c0_i32, %c0_i32_0 : i32, i32
  }
  func.func @transform_2(%arg0: i32, %arg1: i32) -> (i32, i32) {
    %c0_i32 = arith.constant 0 : i32
    %c0_i32_0 = arith.constant 0 : i32
    return %c0_i32, %arg0 : i32, i32
  }
  func.func @transform_3(%arg0: i32, %arg1: i32) -> (i32, i32, i32) {
    %c0_i32 = arith.constant 0 : i32
    %c0_i32_0 = arith.constant 0 : i32
    %c0_i32_1 = arith.constant 0 : i32
    return %arg0, %c0_i32, %c0_i32_0 : i32, i32, i32
  }
  func.func @transform_4(%arg0: i32, %arg1: i32) -> (i32, i32, i32) {
    %c0_i32 = arith.constant 0 : i32
    %c0_i32_0 = arith.constant 0 : i32
    %c0_i32_1 = arith.constant 0 : i32
    return %arg0, %c0_i32, %c0_i32_0 : i32, i32, i32
  }
}

</mosaic_0001>

<bundles_post_ra>
// kernel: conv_block.1
= control target key start
LH: loop header
LB: loop body
LE: loop exit
PB: predicated region body
PF: predicated region fallthrough
CT: control target
= control target key end

     0   :  { %vm24_vm0 = vcmask 523264   ;;  %vm112_vm1 = vcmask 7168   ;;  %s241_s0 = inlined_call_operand.vmem [shape: f32[64,128], index: 0, kind: input, shape index: {}]   ;;  %s242_s1 = inlined_call_operand.vmem [shape: f32[16,64], index: 1, kind: input, shape index: {}]   ;;  %s243_s2 = inlined_call_operand.vmem [shape: f32[16,128], index: 2, kind: output, shape index: {0}]   ;;  %s244_s3 = inlined_call_operand.vmem [shape: f32[1,16,1], index: 3, kind: output, shape index: {1}]   ;;  %s245_s4 = inlined_call_operand.vmem [shape: f32[1,16,1], index: 4, kind: output, shape index: {2}]  }
   0x1   :  { %v23_v0 = vld [vmem:[%s241_s0 + $0x38] sm:$0xff]  ;;  %v22_v1 = vld [vmem:[%s241_s0 + $0x30] sm:$0xff]  ;;  %v21_v2 = vld [vmem:[%s241_s0 + $0x28] sm:$0xff] }
   0x2   :  { %147 = vmatprep.subr.mxu0 %v23_v0  ;;  %v14_v3 = vld [vmem:[%s242_s1] sm:$0xff]  ;;  %v19_v5 = vld [vmem:[%s241_s0 + $0x18] sm:$0xff]  ;;  %v18_v6 = vld [vmem:[%s241_s0 + $0x10] sm:$0xff] }
   0x3   :  { %148 = vmatpush3.msra.mxu0 %v23_v0  ;;  %163 = vmatprep.mubr.msk.f32.mxu0 %vm24_vm0, %v14_v3  ;;  %v20_v4 = vld [vmem:[%s241_s0 + $0x20] sm:$0xff]  ;;  %v17_v7 = vld [vmem:[%s241_s0 + $0x8] sm:$0xff] }
   0x4   :  { %149 = vmatprep.subr.mxu0 %v22_v1  ;;  %v16_v8 = vld [vmem:[%s241_s0] sm:$0xff]  ;;  %v15_v9 = vld [vmem:[%s242_s1 + $0x8] sm:$0xff] }
   0x5   :  { %150 = vmatpush3.msra.mxu0 %v22_v1 }
   0x6   :  { %151 = vmatprep.subr.mxu0 %v21_v2 }
   0x7   :  { %152 = vmatpush3.msra.mxu0 %v21_v2 }
   0x8   :  { %153 = vmatprep.subr.mxu0 %v20_v4 }
   0x9   :  { %154 = vmatpush3.msra.mxu0 %v20_v4 }
   0xa   :  { %155 = vmatprep.subr.mxu0 %v19_v5 }
   0xb   :  { %156 = vmatpush3.msra.mxu0 %v19_v5 }
   0xc   :  { %157 = vmatprep.subr.mxu0 %v18_v6 }
   0xd   :  { %158 = vmatpush3.msra.mxu0 %v18_v6 }
   0xe   :  { %159 = vmatprep.subr.mxu0 %v17_v7 }
   0xf   :  { %160 = vmatpush3.msra.mxu0 %v17_v7 }
  0x10   :  { %161 = vmatprep.subr.mxu0 %v16_v8 }
  0x11   :  { %162 = vmatpush3.msra.mxu0 %v16_v8 }
  0x12   :  { %164 = vmatmul.mubr.msk.f32.vlgmr.msra.gmra.mxu0 %vm24_vm0, %v15_v9 }
  0xd2   :  { %v165_v10 = vpop.f32.mrf.mxu0 }
  0xd3   :  { %107 = vst [vmem:[%s243_s2 + $0x8] sm:$0xff] %v165_v10  ;;  %v116_v13 = vmul.f32 %v165_v10, %v165_v10 }
  0xd4   :  { %v97_v11 = vpop.f32.mrf.mxu0 }
  0xd5   :  { %106 = vst [vmem:[%s243_s2] sm:$0xff] %v97_v11  ;;  %108 = vadd.xlane.f32.xlu0 %v97_v11  ;;  %v115_v12 = vmul.f32 %v97_v11, %v97_v11 }
  0xd7   :  { %117 = vadd.xlane.f32.xlu1 %v115_v12 }
  0xd9   :  { %110 = vadd.xlane.f32.xlu0 %v165_v10 }
  0xdb   :  { %119 = vadd.xlane.f32.xlu1 %v116_v13 }
 0x15e   :  { %v109_v14 = vpop.xlane.xlu0 %108 }
 0x15f   :  { %113 = vst.msk [vmem:[%s244_s3] sm:$0xff] %vm112_vm1, %v109_v14 }
 0x160   :  { %v118_v15 = vpop.xlane.xlu1 %117 }
 0x161   :  { %121 = vst.msk [vmem:[%s245_s4] sm:$0xff] %vm112_vm1, %v118_v15 }
 0x162   :  { %v111_v16 = vpop.xlane.xlu0 %110 }
 0x163   :  { %114 = vst.msk [vmem:[%s244_s3 + $0x8] sm:$0xff] %vm112_vm1, %v111_v16 }
 0x164   :  { %v120_v17 = vpop.xlane.xlu1 %119 }
 0x165   :  { %122 = vst.msk [vmem:[%s245_s4 + $0x8] sm:$0xff] %vm112_vm1, %v120_v17 }

</bundles_post_ra>
